<compile_context>
chip_gen: v7x
topology: tpu7x:2x2x1
jax: 0.10.0
libtpu: 0.0.40
codegen_flags: <defaults>
</compile_context>

<pallas_src>
import functools

import jax
import jax.numpy as jnp
from jax import lax
from jax.experimental import pallas as pl
from jax.experimental.pallas import tpu as pltpu


def _focal_kernel(logits_ref, label_ref, out_ref, *, alpha, gamma, n_valid,
                  block_rows, lanes, n_steps):
    c = pl.program_id(0)   # parallel split (megacore on v7x)
    i = pl.program_id(1)   # reduction steps within the split

    @pl.when(i == 0)
    def _():
        out_ref[...] = jnp.zeros_like(out_ref)

    x = logits_ref[...].astype(jnp.float32)
    y = label_ref[...].astype(jnp.float32)

    # One exp + one log1p + one divide per element (shared by sigmoid and both
    # stable log-sigmoid branches, matching the PyTorch softplus formulation):
    #   e  = exp(-|x|), sp = log1p(e)
    #   probs        = where(x>=0, 1, e) / (1+e)           (= sigmoid(x))
    #   log_probs    = min(x, 0) - sp                       (= log_sigmoid(x))
    #   log_1_probs  = log_probs - x                        (= log_sigmoid(-x))
    e = jnp.exp(-jnp.abs(x))
    sp = jnp.log1p(e)
    probs = jnp.where(x >= 0, 1.0, e) / (1.0 + e)
    log_probs = jnp.minimum(x, 0.0) - sp
    log_1_probs = log_probs - x

    d = y - probs
    if gamma == 2.0:
        coeff = -(d * d)                       # specialize default gamma: pure VPU
    else:
        coeff = -(jnp.abs(d) ** gamma)         # fallback (EUP pow)

    loss = (y * alpha * log_probs + (1.0 - y) * (1.0 - alpha) * log_1_probs) * coeff

    # Intended (unclamped) block owned by this grid step. Only tiles that may
    # reach past the valid element count take the masked path. The predicate is
    # expressed in row units (no n * lanes product -> no i32 overflow risk).
    blk = c * n_steps + i
    row_off = blk * block_rows
    full_valid_rows = n_valid // lanes
    needs_mask = row_off + block_rows > full_valid_rows

    def _accumulate(vals):
        # (block_rows,128) -> (block_rows//8, 8, 128); sum over the leading axis
        # is a vreg-wise VPU add tree; keeps partials lane-resident.
        out_ref[...] += vals.reshape(-1, 8, lanes).sum(axis=0)

    @pl.when(jnp.logical_not(needs_mask))
    def _():
        _accumulate(loss)

    @pl.when(needs_mask)
    def _():
        rid = lax.broadcasted_iota(jnp.int32, (block_rows, lanes), 0)
        lid = lax.broadcasted_iota(jnp.int32, (block_rows, lanes), 1)
        gidx = (row_off + rid) * lanes + lid
        _accumulate(jnp.where(gidx < n_valid, loss, 0.0))


def focal_loss_v1(logits, label, alpha=0.25, gamma=2.0, reduction="mean",
                  block_rows=2048, lanes=128, num_splits=2):
    """Pallas implementation of FocalLossV1.forward (reduction: 'mean' or 'sum')."""
    assert logits.shape == label.shape
    # TODO(synk): reduction='none' (per-element output) not implemented here.
    assert reduction in ("mean", "sum")

    n = int(logits.size)
    flat_logits = logits.reshape(-1)
    flat_label = label.reshape(-1)

    # Pad only to the next lane (128) boundary so the 2-D reshape is a free
    # bitcast; padded elements (and any Pallas block overhang) are masked
    # in-kernel. Lane-aligned inputs (the common segmentation case) pay nothing.
    tail = (-n) % lanes
    if tail:
        flat_logits = jnp.pad(flat_logits, (0, tail))
        flat_label = jnp.pad(flat_label, (0, tail))
    rows = (n + tail) // lanes

    l2 = flat_logits.reshape(rows, lanes)
    y2 = flat_label.reshape(rows, lanes)

    # Clamp tile height: multiple of 8 sublanes, no bigger than the data.
    rows8 = -(-rows // 8) * 8
    block_rows = max(8, min((int(block_rows) // 8) * 8, rows8))

    n_blocks = -(-rows // block_rows)
    n_split = max(1, min(int(num_splits), n_blocks))
    n_steps = -(-n_blocks // n_split)

    def in_map(c, i):
        # Clamp so grid-tail steps never DMA out of range; their contribution is
        # fully masked in-kernel (the mask uses the *intended* block index).
        return (jnp.minimum(c * n_steps + i, n_blocks - 1), 0)

    kernel = functools.partial(
        _focal_kernel, alpha=float(alpha), gamma=float(gamma), n_valid=n,
        block_rows=block_rows, lanes=lanes, n_steps=n_steps)

    partials = pl.pallas_call(
        kernel,
        out_shape=jax.ShapeDtypeStruct((n_split * 8, lanes), jnp.float32),
        grid_spec=pltpu.PrefetchScalarGridSpec(
            num_scalar_prefetch=0,
            grid=(n_split, n_steps),
            in_specs=[
                pl.BlockSpec((block_rows, lanes), in_map),
                pl.BlockSpec((block_rows, lanes), in_map),
            ],
            out_specs=pl.BlockSpec((8, lanes), lambda c, i: (c, 0)),
        ),
        compiler_params=pltpu.CompilerParams(
            dimension_semantics=("parallel", "arbitrary")),
    )(l2, y2)

    total = jnp.sum(partials)
    if reduction == "mean":
        total = total / n
    return total


def _focal_loss_ref(logits, label, alpha=0.25, gamma=2.0, reduction="mean"):
    x = logits.astype(jnp.float32)
    y = label.astype(jnp.float32)
    probs = jax.nn.sigmoid(x)
    coeff = -(jnp.abs(y - probs) ** gamma)
    log_probs = jax.nn.log_sigmoid(x)
    log_1_probs = jax.nn.log_sigmoid(-x)
    loss = (y * alpha * log_probs + (1.0 - y) * (1.0 - alpha) * log_1_probs) * coeff
    return jnp.mean(loss) if reduction == "mean" else jnp.sum(loss)


if __name__ == "__main__":
    key = jax.random.PRNGKey(0)
    k1, k2 = jax.random.split(key)

    # Main case: NCHW, lane-aligned, mean reduction (matches PyTorch usage).
    B, C, H, W = 2, 4, 16, 16
    logits = jax.random.normal(k1, (B, C, H, W), dtype=jnp.float32)
    # bf16 labels are exact for {0,1} and halve the label HBM stream.
    label = jax.random.bernoulli(k2, 0.5, (B, C, H, W)).astype(jnp.bfloat16)
    out = jax.block_until_ready(focal_loss_v1(logits, label))
    ref = _focal_loss_ref(logits, label.astype(jnp.float32))
    assert jnp.allclose(out, ref, atol=1e-5, rtol=1e-4), (out, ref)

    # Ragged case (n % 128 != 0): exercises in-kernel tail masking, 'sum' mode.
    k3, k4 = jax.random.split(k1)
    lg2 = jax.random.normal(k3, (3, 5, 7, 11), dtype=jnp.float32)
    lb2 = jax.random.bernoulli(k4, 0.5, (3, 5, 7, 11)).astype(jnp.bfloat16)
    out2 = jax.block_until_ready(focal_loss_v1(lg2, lb2, reduction="sum"))
    ref2 = _focal_loss_ref(lg2, lb2.astype(jnp.float32), reduction="sum")
    assert jnp.allclose(out2, ref2, atol=1e-4, rtol=1e-4), (out2, ref2)

    # Multi-block + 2-way split with odd block count: exercises the parallel
    # axis, multi-step accumulation, and the clamped/masked grid tail.
    k5, k6 = jax.random.split(k2)
    lg3 = jax.random.normal(k5, (4, 8, 32, 64), dtype=jnp.float32)
    lb3 = jax.random.bernoulli(k6, 0.5, (4, 8, 32, 64)).astype(jnp.bfloat16)
    out3 = jax.block_until_ready(focal_loss_v1(lg3, lb3, block_rows=48))
    ref3 = _focal_loss_ref(lg3, lb3.astype(jnp.float32))
    assert jnp.allclose(out3, ref3, atol=1e-5, rtol=1e-4), (out3, ref3)

    # Non-default gamma path (EUP pow fallback).
    out4 = jax.block_until_ready(focal_loss_v1(logits, label, gamma=1.5))
    ref4 = _focal_loss_ref(logits, label.astype(jnp.float32), gamma=1.5)
    assert jnp.allclose(out4, ref4, atol=1e-5, rtol=1e-4), (out4, ref4)

    print("KERNEL_OK")
</pallas_src>

<mosaic_0001>
module attributes {stable_mosaic.version = 11 : i64} {
  func.func @_focal_kernel(%arg0: i32, %arg1: i32, %arg2: memref<16x128xf32, #tpu.memory_space<vmem>>, %arg3: memref<16x128xbf16, #tpu.memory_space<vmem>>, %arg4: memref<8x128xf32, #tpu.memory_space<vmem>>) attributes {dimension_semantics = [#tpu.dimension_semantics<parallel>, #tpu.dimension_semantics<arbitrary>], iteration_bounds = array<i64: 1, 1>, scalar_prefetch = 0 : i64, scratch_operands = 0 : i64, tpu.core_type = #tpu.core_type<tc>, window_params = [{transform_indices = @transform_0, window_bounds = array<i64: 16, 128>}, {transform_indices = @transform_1, window_bounds = array<i64: 16, 128>}, {transform_indices = @transform_2, window_bounds = array<i64: 8, 128>}]} {
    %c0_i32 = arith.constant 0 : i32
    %0 = arith.cmpi eq, %arg1, %c0_i32 : i32
    %1 = arith.extui %0 : i1 to i32
    %c0_i32_0 = arith.constant 0 : i32
    %2 = arith.cmpi ne, %1, %c0_i32_0 : i32
    scf.if %2 {
      %cst_16 = arith.constant 0.000000e+00 : f32
      %46 = vector.broadcast %cst_16 : f32 to vector<8x128xf32>
      %c0_17 = arith.constant 0 : index
      %c0_18 = arith.constant 0 : index
      %47 = vector.load %arg4[%c0_17, %c0_18] : memref<8x128xf32, #tpu.memory_space<vmem>>, vector<8x128xf32>
      tpu.vector_store %arg4[%c0_17, %c0_18], %46 {strides = array<i32>} : memref<8x128xf32, #tpu.memory_space<vmem>>, vector<8x128xf32>,
    } else {
    }
    %c0 = arith.constant 0 : index
    %c0_1 = arith.constant 0 : index
    %3 = vector.load %arg2[%c0, %c0_1] : memref<16x128xf32, #tpu.memory_space<vmem>>, vector<16x128xf32>
    %c0_2 = arith.constant 0 : index
    %c0_3 = arith.constant 0 : index
    %4 = vector.load %arg3[%c0_2, %c0_3] : memref<16x128xbf16, #tpu.memory_space<vmem>>, vector<16x128xbf16>
    %5 = arith.extf %4 : vector<16x128xbf16> to vector<16x128xf32>
    %6 = math.absf %3 : vector<16x128xf32>
    %cst = arith.constant 0.000000e+00 : f32
    %7 = vector.broadcast %cst : f32 to vector<16x128xf32>
    %8 = arith.subf %7, %6 : vector<16x128xf32>
    %9 = math.exp %8 : vector<16x128xf32>
    %10 = math.log1p %9 : vector<16x128xf32>
    %cst_4 = arith.constant 0.000000e+00 : f32
    %11 = vector.broadcast %cst_4 : f32 to vector<16x128xf32>
    %12 = arith.cmpf oge, %3, %11 : vector<16x128xf32>
    %cst_5 = arith.constant 1.000000e+00 : f32
    %13 = vector.broadcast %cst_5 : f32 to vector<16x128xf32>
    %14 = arith.select %12, %13, %9 : vector<16x128xi1>, vector<16x128xf32>
    %cst_6 = arith.constant 1.000000e+00 : f32
    %15 = vector.broadcast %cst_6 : f32 to vector<16x128xf32>
    %16 = arith.addf %15, %9 : vector<16x128xf32>
    %17 = arith.divf %14, %16 : vector<16x128xf32>
    %cst_7 = arith.constant 0.000000e+00 : f32
    %18 = vector.broadcast %cst_7 : f32 to vector<16x128xf32>
    %19 = arith.minimumf %3, %18 : vector<16x128xf32>
    %20 = arith.subf %19, %10 : vector<16x128xf32>
    %21 = arith.subf %20, %3 : vector<16x128xf32>
    %22 = arith.subf %5, %17 : vector<16x128xf32>
    %23 = arith.mulf %22, %22 : vector<16x128xf32>
    %cst_8 = arith.constant 0.000000e+00 : f32
    %24 = vector.broadcast %cst_8 : f32 to vector<16x128xf32>
    %25 = arith.subf %24, %23 : vector<16x128xf32>
    %cst_9 = arith.constant 2.500000e-01 : f32
    %26 = vector.broadcast %cst_9 : f32 to vector<16x128xf32>
    %27 = arith.mulf %5, %26 : vector<16x128xf32>
    %28 = arith.mulf %27, %20 : vector<16x128xf32>
    %cst_10 = arith.constant 1.000000e+00 : f32
    %29 = vector.broadcast %cst_10 : f32 to vector<16x128xf32>
    %30 = arith.subf %29, %5 : vector<16x128xf32>
    %cst_11 = arith.constant 7.500000e-01 : f32
    %31 = vector.broadcast %cst_11 : f32 to vector<16x128xf32>
    %32 = arith.mulf %30, %31 : vector<16x128xf32>
    %33 = arith.mulf %32, %21 : vector<16x128xf32>
    %34 = arith.addf %28, %33 : vector<16x128xf32>
    %35 = arith.mulf %34, %25 : vector<16x128xf32>
    %c1_i32 = arith.constant 1 : i32
    %36 = arith.muli %arg0, %c1_i32 : i32
    %37 = arith.addi %36, %arg1 : i32
    %c16_i32 = arith.constant 16 : i32
    %38 = arith.muli %37, %c16_i32 : i32
    %c16_i32_12 = arith.constant 16 : i32
    %39 = arith.addi %38, %c16_i32_12 : i32
    %c16_i32_13 = arith.constant 16 : i32
    %40 = arith.cmpi sgt, %39, %c16_i32_13 : i32
    %true = arith.constant true
    %41 = arith.xori %40, %true : i1
    %42 = arith.extui %41 : i1 to i32
    %c0_i32_14 = arith.constant 0 : i32
    %43 = arith.cmpi ne, %42, %c0_i32_14 : i32
    scf.if %43 {
      %c0_16 = arith.constant 0 : index
      %c0_17 = arith.constant 0 : index
      %46 = vector.load %arg4[%c0_16, %c0_17] : memref<8x128xf32, #tpu.memory_space<vmem>>, vector<8x128xf32>
      %47 = vector.shape_cast %35 : vector<16x128xf32> to vector<2x8x128xf32>
      %cst_18 = arith.constant dense<0.000000e+00> : vector<8x128xf32>
      %48 = vector.multi_reduction <add>, %47, %cst_18 [0] : vector<2x8x128xf32> to vector<8x128xf32>
      %49 = arith.addf %46, %48 : vector<8x128xf32>
      %c0_19 = arith.constant 0 : index
      %c0_20 = arith.constant 0 : index
      %50 = vector.load %arg4[%c0_19, %c0_20] : memref<8x128xf32, #tpu.memory_space<vmem>>, vector<8x128xf32>
      tpu.vector_store %arg4[%c0_19, %c0_20], %49 {strides = array<i32>} : memref<8x128xf32, #tpu.memory_space<vmem>>, vector<8x128xf32>,
    } else {
    }
    %44 = arith.extui %40 : i1 to i32
    %c0_i32_15 = arith.constant 0 : i32
    %45 = arith.cmpi ne, %44, %c0_i32_15 : i32
    scf.if %45 {
      %46 = tpu.iota {dimensions = array<i32: 0>} : vector<16x128xi32>
      %47 = tpu.iota {dimensions = array<i32: 1>} : vector<16x128xi32>
      %48 = vector.broadcast %38 : i32 to vector<16x128xi32>
      %49 = arith.addi %48, %46 : vector<16x128xi32>
      %c128_i32 = arith.constant 128 : i32
      %50 = vector.broadcast %c128_i32 : i32 to vector<16x128xi32>
      %51 = arith.muli %49, %50 : vector<16x128xi32>
      %52 = arith.addi %51, %47 : vector<16x128xi32>
      %c2048_i32 = arith.constant 2048 : i32
      %53 = vector.broadcast %c2048_i32 : i32 to vector<16x128xi32>
      %54 = arith.cmpi slt, %52, %53 : vector<16x128xi32>
      %cst_16 = arith.constant 0.000000e+00 : f32
      %55 = vector.broadcast %cst_16 : f32 to vector<16x128xf32>
      %56 = arith.select %54, %35, %55 : vector<16x128xi1>, vector<16x128xf32>
      %c0_17 = arith.constant 0 : index
      %c0_18 = arith.constant 0 : index
      %57 = vector.load %arg4[%c0_17, %c0_18] : memref<8x128xf32, #tpu.memory_space<vmem>>, vector<8x128xf32>
      %58 = vector.shape_cast %56 : vector<16x128xf32> to vector<2x8x128xf32>
      %cst_19 = arith.constant dense<0.000000e+00> : vector<8x128xf32>
      %59 = vector.multi_reduction <add>, %58, %cst_19 [0] : vector<2x8x128xf32> to vector<8x128xf32>
      %60 = arith.addf %57, %59 : vector<8x128xf32>
      %c0_20 = arith.constant 0 : index
      %c0_21 = arith.constant 0 : index
      %61 = vector.load %arg4[%c0_20, %c0_21] : memref<8x128xf32, #tpu.memory_space<vmem>>, vector<8x128xf32>
      tpu.vector_store %arg4[%c0_20, %c0_21], %60 {strides = array<i32>} : memref<8x128xf32, #tpu.memory_space<vmem>>, vector<8x128xf32>,
    } else {
    }
    return
  }
  func.func @transform_0(%arg0: i32, %arg1: i32) -> (i32, i32) {
    %c1_i32 = arith.constant 1 : i32
    %0 = arith.muli %arg0, %c1_i32 : i32
    %1 = arith.addi %0, %arg1 : i32
    %c0_i32 = arith.constant 0 : i32
    %2 = arith.minsi %1, %c0_i32 : i32
    %c0_i32_0 = arith.constant 0 : i32
    %c0_i32_1 = arith.constant 0 : i32
    return %2, %c0_i32_0 : i32, i32
  }
  func.func @transform_1(%arg0: i32, %arg1: i32) -> (i32, i32) {
    %c1_i32 = arith.constant 1 : i32
    %0 = arith.muli %arg0, %c1_i32 : i32
    %1 = arith.addi %0, %arg1 : i32
    %c0_i32 = arith.constant 0 : i32
    %2 = arith.minsi %1, %c0_i32 : i32
    %c0_i32_0 = arith.constant 0 : i32
    %c0_i32_1 = arith.constant 0 : i32
    return %2, %c0_i32_0 : i32, i32
  }
  func.func @transform_2(%arg0: i32, %arg1: i32) -> (i32, i32) {
    %c0_i32 = arith.constant 0 : i32
    %c0_i32_0 = arith.constant 0 : i32
    return %arg0, %c0_i32 : i32, i32
  }
}

</mosaic_0001>

<bundles_post_ra>
// kernel: tpu_custom_call.1
= control target key start
LH: loop header
LB: loop body
LE: loop exit
PB: predicated region body
PF: predicated region fallthrough
CT: control target
= control target key end

     0   :  { %7 = vsyncpa [#allocation3], 0  ;;  %s360_s0 = inlined_call_operand.hbm [shape: f32[16,128], index: 0, kind: input, shape index: {}]   ;;  %s361_s1 = inlined_call_operand.hbm [shape: bf16[16,128], index: 1, kind: input, shape index: {}]   ;;  %s362_s2 = inlined_call_operand.hbm [shape: f32[8,128], index: 2, kind: output, shape index: {}]  }
   0x1   :  { %8 = vsyncpa [#allocation6], 0 }
   0x2   :  { %9 = vsyncpa [#allocation4], 0  ;;  %s284_s9 = smov [#allocation2]   ;;  %s212_s13 = scalar_lea.hbm %s360_s0, 256 }
   0x3   :  { %s21_s10 = sshll.u32 %s284_s9, 4  ;;  %p213_p0 = scmp.ne.s32.totalorder %s360_s0, %s212_s13  ;;  %s22_s10 = int_to_ptr.vmem [resolvable:$true] %s21_s10 }
   0x4   :  { %p216_p1 = scmp.lt.u32.totalorder %s212_s13, %s360_s0 }
   0x6   :  { %p218_p2 = pnand %p216_p1, %p213_p0 }
   0x8   :  { %221 = shalt.err (!%p218_p2)
}
   0x9   :  { %s222_s18 = scalar_lea.vmem %s22_s10, 256  ;;  %p227_p4 = scmp.lt.s32.totalorder %s22_s10, %s22_s10 }
   0xa   :  { %p223_p3 = scmp.ne.s32.totalorder %s22_s10, %s222_s18  ;;  %p228_p5 = scmp.lt.s32.totalorder %s222_s18, %s222_s18 }
   0xc   :  { %p229_p6 = por %p228_p5, %p227_p4 }
   0xe   :  { %p230_p7 = pnand %p229_p6, %p223_p3 }
  0x10   :  { %233 = shalt.err (!%p230_p7)
}
  0x11   :  { %s285_s19 = smov 128   ;;  %s286_s20 = smov 8  }
  0x12   :  { %27 = dma.hbm_to_vmem [thread:$0]  %s360_s0, 256, %s22_s10, [#allocation3], %s285_s19, %s285_s19, %s286_s20  }
  0x13   :  { %s287_s23 = smov [#allocation5]   ;;  %s234_s27 = scalar_lea.hbm %s361_s1, 128 }
  0x14   :  { %s39_s24 = sshll.u32 %s287_s23, 4  ;;  %p235_p8 = scmp.ne.s32.totalorder %s361_s1, %s234_s27  ;;  %s40_s24 = int_to_ptr.vmem [resolvable:$true] %s39_s24 }
  0x15   :  { %p238_p9 = scmp.lt.u32.totalorder %s234_s27, %s361_s1 }
  0x17   :  { %p240_p10 = pnand %p238_p9, %p235_p8 }
  0x19   :  { %243 = shalt.err (!%p240_p10)
}
  0x1a   :  { %s244_s4 = scalar_lea.vmem %s40_s24, 128  ;;  %p249_p12 = scmp.lt.s32.totalorder %s40_s24, %s40_s24 }
  0x1b   :  { %p245_p11 = scmp.ne.s32.totalorder %s40_s24, %s244_s4  ;;  %p250_p13 = scmp.lt.s32.totalorder %s244_s4, %s244_s4 }
  0x1d   :  { %p251_p0 = por %p250_p13, %p249_p12 }
  0x1f   :  { %p252_p1 = pnand %p251_p0, %p245_p11 }
  0x21   :  { %255 = shalt.err (!%p252_p1)
}
  0x22   :  { %s288_s0 = smov 64   ;;  %s289_s5 = smov 4  }
  0x23   :  { %45 = dma.hbm_to_vmem [thread:$0]  %s361_s1, 128, %s40_s24, [#allocation6], %s288_s0, %s288_s0, %s289_s5  }
  0x24   :  { %278 = dma.done.wait [#allocation3], 256  }
  0x25   :  { %279 = vsyncadd [#allocation3], 4294967040 }
  0x26   :  { %280 = dma.done.wait [#allocation6], 128  }
  0x27   :  { %281 = vsyncadd [#allocation6], 4294967168  ;;  %v330_v0 = vld [vmem:[#allocation2] sm:$0xff]  ;;  %v332_v1 = vld [vmem:[#allocation2 + $0x8] sm:$0xff]  ;;  %s290_s1 = smov [#allocation7]  }
  0x28   :  { %v71_v2 = vand.u32 2147483647, %v330_v0  ;;  %v72_v3 = vand.u32 2147483647, %v332_v1  ;;  %v189_v14 = vld [vmem:[#allocation5] sm:$0xff]   ;;  %vm97_vm0 = vcmp.ge.f32.partialorder %v330_v0, 0.0 }
  0x29   :  { %v190_v16 = vunpack.c.l.bf16 %v189_v14  ;;  %v191_v19 = vunpack.c.h.bf16 %v189_v14  ;;  %vm98_vm1 = vcmp.ge.f32.partialorder %v332_v1, 0.0  ;;  %v107_v22 = vmin.f32 %v330_v0, 0.0  ;;  %s174_s8 = sshll.u32 %s290_s1, 4  ;;  %s175_s8 = int_to_ptr.vmem [resolvable:$true] %s174_s8 }
  0x2a   :  { %v73_v4 = vsub.f32 0.0, %v71_v2  ;;  %v74_v5 = vsub.f32 0.0, %v72_v3  ;;  %v108_v23 = vmin.f32 %v332_v1, 0.0  ;;  %s256_s9 = scalar_lea.vmem %s175_s8, 128  ;;  %p261_p3 = scmp.lt.s32.totalorder %s175_s8, %s175_s8 }
  0x2b   :  { %v123_v28 = vsub.f32 1.0, %v190_v16  ;;  %v124_v32 = vsub.f32 1.0, %v191_v19  ;;  %v119_v35 = vmul.f32 0.25, %v190_v16  ;;  %v120_v39 = vmul.f32 0.25, %v191_v19  ;;  %p257_p2 = scmp.ne.s32.totalorder %s175_s8, %s256_s9  ;;  %p262_p4 = scmp.lt.s32.totalorder %s256_s9, %s256_s9 }
  0x2c   :  { %v75_v6 = vmul.f32 1.442695, %v73_v4  ;;  %v77_v7 = vmul.f32 1.442695, %v74_v5 }
  0x2d   :  { %v125_v43 = vmul.f32 0.75, %v123_v28  ;;  %v126_v46 = vmul.f32 0.75, %v124_v32  ;;  %p263_p5 = por %p262_p4, %p261_p3 }
  0x2e   :  { %200 = vpow2.f32 %v75_v6 }
  0x2f   :  { %202 = vpow2.f32 %v77_v7  ;;  %p264_p6 = pnand %p263_p5, %p257_p2 }
  0x38   :  { %v201_v8 = vpop.eup %200 }
  0x39   :  { %v203_v9 = vpop.eup %202  ;;  %v79_v10 = vadd.f32 1.0, %v201_v8  ;;  %v82_v12 = vmul.f32 -0.5, %v201_v8  ;;  %v85_v17 = vand.u32 2147483647, %v201_v8  ;;  %v99_v27 = vsel %vm97_vm0, 1.0, %v201_v8 }
  0x3a   :  { %v88_v11 = vadd.f32 1.0, %v203_v9  ;;  %v91_v13 = vmul.f32 -0.5, %v203_v9  ;;  %v94_v20 = vand.u32 2147483647, %v203_v9  ;;  %v100_v31 = vsel %vm98_vm1, 1.0, %v203_v9 }
  0x3b   :  { %204 = vlog2.f32 %v79_v10  ;;  %v83_v15 = vadd.f32 1.0, %v82_v12  ;;  %vm340_vm2 = vcmp.lt.f32.partialorder %v85_v17, 0.0004427343 }
  0x3c   :  { %206 = vlog2.f32 %v88_v11  ;;  %v92_v18 = vadd.f32 1.0, %v91_v13  ;;  %vm95_vm3 = vcmp.lt.f32.partialorder %v94_v20, 0.0004427343 }
  0x3d   :  { %208 = vrcp.f32 %v79_v10  ;;  %v84_v21 = vmul.f32 %v201_v8, %v83_v15 }
  0x3e   :  { %210 = vrcp.f32 %v88_v11  ;;  %v93_v26 = vmul.f32 %v203_v9, %v92_v18 }
  0x45   :  { %v205_v24 = vpop.eup %204 }
  0x46   :  { %v207_v29 = vpop.eup %206  ;;  %v81_v30 = vmul.f32 0.6931472, %v205_v24 }
  0x47   :  { %v209_v33 = vpop.eup %208  ;;  %v90_v34 = vmul.f32 0.6931472, %v207_v29 }
  0x48   :  { %v211_v36 = vpop.eup %210  ;;  %v87_v37 = vsel %vm340_vm2, %v84_v21, %v81_v30  ;;  %v104_v38 = vmul.f32 %v209_v33, %v99_v27 }
  0x49   :  { %v96_v40 = vsel %vm95_vm3, %v93_v26, %v90_v34  ;;  %v106_v41 = vmul.f32 %v211_v36, %v100_v31  ;;  %v109_v42 = vsub.f32 %v107_v22, %v87_v37 }
  0x4a   :  { %v110_v44 = vsub.f32 %v108_v23, %v96_v40  ;;  %v113_v45 = vsub.f32 %v190_v16, %v104_v38 }
  0x4b   :  { %v111_v47 = vsub.f32 %v109_v42, %v330_v0  ;;  %v114_v48 = vsub.f32 %v191_v19, %v106_v41  ;;  %v121_v49 = vmul.f32 %v119_v35, %v109_v42 }
  0x4c   :  { %v112_v50 = vsub.f32 %v110_v44, %v332_v1  ;;  %v115_v51 = vmul.f32 %v113_v45, %v113_v45  ;;  %v122_v52 = vmul.f32 %v120_v39, %v110_v44 }
  0x4d   :  { %v116_v53 = vmul.f32 %v114_v48, %v114_v48  ;;  %v127_v54 = vmul.f32 %v125_v43, %v111_v47 }
  0x4e   :  { %v117_v55 = vsub.f32 0.0, %v115_v51  ;;  %v128_v56 = vmul.f32 %v126_v46, %v112_v50 }
  0x4f   :  { %v118_v57 = vsub.f32 0.0, %v116_v53  ;;  %v129_v58 = vadd.f32 %v127_v54, %v121_v49 }
  0x50   :  { %v130_v59 = vadd.f32 %v128_v56, %v122_v52 }
  0x51   :  { %v131_v60 = vmul.f32 %v129_v58, %v117_v55 }
  0x52   :  { %v132_v61 = vmul.f32 %v130_v59, %v118_v57 }
  0x54   :  { %v142_v62 = vadd.f32 %v132_v61, %v131_v60 }
  0x56   :  { %144 = vst [vmem:[#allocation7] sm:$0xff] %v142_v62 }
  0x57   :  { %267 = shalt.err (!%p264_p6)
}
  0x58   :  { %s268_s12 = scalar_lea.hbm %s362_s2, 128 }
  0x59   :  { %p269_p7 = scmp.ne.s32.totalorder %s362_s2, %s268_s12  ;;  %p272_p8 = scmp.lt.u32.totalorder %s268_s12, %s362_s2 }
  0x5b   :  { %p274_p9 = pnand %p272_p8, %p269_p7 }
  0x5d   :  { %277 = shalt.err (!%p274_p9)
}
  0x5e   :  { %177 = dma.vmem_to_hbm [thread:$0]  %s175_s8, 128, %s362_s2, [#allocation4]  }
  0x5f   :  { %282 = dma.done.wait [#allocation4], 128  }
  0x60   :  { %283 = vsyncadd [#allocation4], 4294967168 }
  0x61   :  { %181 = vsyncpa [#allocation3], 1 }
  0x62   :  { %182 = vsyncpa [#allocation6], 1 }
  0x63   :  { %183 = vsyncpa [#allocation4], 1 }

</bundles_post_ra>
